<compile_context>
chip_gen: v6e
topology: v6e:2x2x1
jax: 0.10.0
libtpu: 0.0.40
codegen_flags: <defaults>
</compile_context>

<pallas_src>
import jax
import jax.numpy as jnp
from jax.experimental import pallas as pl
from jax.experimental.pallas import tpu as pltpu


DEFAULT_TASK_CONFIGS = {
    "speed":        {"dim": 1, "activation": "relu"},
    "direction":    {"dim": 2, "activation": "tanh"},
    "acceleration": {"dim": 1, "activation": "linear"},
    "state":        {"dim": 3, "activation": "softmax"},
}

HEAD_HIDDEN = 64  # nn.Linear(shared_out_dim, 64) in every task head


def _round_up(n, m):
    return ((n + m - 1) // m) * m


# ----------------------------------------------------------------------------- kernel
def _fused_decoder_kernel(x_ref, w1_ref, w2_ref, wh1_ref, wh2_ref, b_ref, o_ref):
    """One batch-tile of the full decoder: trunk (2x Linear+ReLU) + fused task heads."""
    cdt = w1_ref.dtype                      # bf16 compute dtype for the MXU
    H1 = w1_ref.shape[1]
    H2 = w2_ref.shape[1]
    HH = wh1_ref.shape[1]
    DP = wh2_ref.shape[1]

    # x arrives f32; cast to bf16 in-kernel (VPU work hidden under the MXU).
    xc = x_ref[...].astype(cdt)

    # Shared layer 1: Linear + ReLU   (Dropout -> identity in eval mode)
    h = jnp.dot(xc, w1_ref[...], preferred_element_type=jnp.float32)
    h = jnp.maximum(h + b_ref[0:1, :H1], 0.0).astype(cdt)

    # Shared layer 2: Linear + ReLU   (Dropout -> identity in eval mode)
    h = jnp.dot(h, w2_ref[...], preferred_element_type=jnp.float32)
    h = jnp.maximum(h + b_ref[1:2, :H2], 0.0).astype(cdt)

    # All task heads, layer 1 (heads concatenated side-by-side -> lane-dense)
    h = jnp.dot(h, wh1_ref[...], preferred_element_type=jnp.float32)
    h = jnp.maximum(h + b_ref[2:3, :HH], 0.0).astype(cdt)

    # All task heads, layer 2 (block-diagonal weights, output lane-padded to 128)
    out = jnp.dot(h, wh2_ref[...], preferred_element_type=jnp.float32)
    out = out + b_ref[3:4, :DP]
    o_ref[...] = out.astype(o_ref.dtype)    # bf16 store: half the writeback traffic


# ----------------------------------------------------------------------------- wrapper
def multitask_decoder_forward(x, fused, task_configs, block_batch=2048):
    """x: (B, input_dim) f32. Returns dict of per-task outputs (f32)."""
    w1, w2 = fused["w1"], fused["w2"]
    wh1, wh2 = fused["wh1"], fused["wh2"]
    bias = fused["bias_pack"]
    total_dim = fused["total_dim"]

    B, Din = x.shape
    H1, H2 = w1.shape[1], w2.shape[1]
    HH, DP = wh1.shape[1], wh2.shape[1]
    BW = bias.shape[1]

    # Batch tile: as large as requested (amortize per-grid-step overhead), multiple
    # of 8, but capped so the grid has >= 2 steps (v7x: 2 TCs share the "parallel"
    # batch axis; no effect on v5e/v6e).
    half_b = _round_up(max(pl.cdiv(B, 2), 8), 8)
    TB = max(8, (min(block_batch, half_b) // 8) * 8)
    grid = (pl.cdiv(B, TB),)

    out = pl.pallas_call(
        _fused_decoder_kernel,
        out_shape=jax.ShapeDtypeStruct((B, DP), jnp.bfloat16),
        grid=grid,
        in_specs=[
            pl.BlockSpec((TB, Din), lambda i: (i, 0)),     # x (f32): tiled over batch
            pl.BlockSpec((Din, H1), lambda i: (0, 0)),     # weights: VMEM-resident
            pl.BlockSpec((H1, H2), lambda i: (0, 0)),
            pl.BlockSpec((H2, HH), lambda i: (0, 0)),
            pl.BlockSpec((HH, DP), lambda i: (0, 0)),
            pl.BlockSpec((4, BW), lambda i: (0, 0)),       # packed biases (one DMA)
        ],
        out_specs=pl.BlockSpec((TB, DP), lambda i: (i, 0)),
        compiler_params=pltpu.CompilerParams(
            dimension_semantics=("parallel",)),
    )(x, w1, w2, wh1, wh2, bias)

    # Per-task slices + cheap activations in f32 (softmax denominator stays f32).
    raw = out[:, :total_dim].astype(jnp.float32)

    outputs = {}
    off = 0
    for name, cfg in task_configs.items():
        d = cfg["dim"]
        r = raw[:, off:off + d]
        off += d
        act = cfg["activation"]
        if act == "relu":
            outputs[name] = jnp.maximum(r, 0.0)
        elif act == "tanh":
            outputs[name] = jnp.tanh(r)
        elif act == "softmax":
            outputs[name] = jax.nn.softmax(r, axis=-1)
        else:
            outputs[name] = r
    return outputs


# ----------------------------------------------------------------------------- params
def init_params(key, input_dim, shared_hidden_dim=256, task_configs=None):
    """Xavier-uniform weights / zero biases, matching MultiTaskBehaviorDecoder.
    Weights stored as (in, out) == transpose of PyTorch (out, in); math identical."""
    if task_configs is None:
        task_configs = DEFAULT_TASK_CONFIGS

    def xavier(k, fan_in, fan_out):
        bound = (6.0 / (fan_in + fan_out)) ** 0.5
        return jax.random.uniform(k, (fan_in, fan_out), jnp.float32,
                                  minval=-bound, maxval=bound)

    H1 = shared_hidden_dim
    H2 = shared_hidden_dim // 2

    key, k1, k2 = jax.random.split(key, 3)
    params = {
        "w1": xavier(k1, input_dim, H1), "b1": jnp.zeros((H1,), jnp.float32),
        "w2": xavier(k2, H1, H2),        "b2": jnp.zeros((H2,), jnp.float32),
        "heads": {},
    }
    for name, cfg in task_configs.items():
        key, ka, kb = jax.random.split(key, 3)
        params["heads"][name] = {
            "w1": xavier(ka, H2, HEAD_HIDDEN),
            "b1": jnp.zeros((HEAD_HIDDEN,), jnp.float32),
            "w2": xavier(kb, HEAD_HIDDEN, cfg["dim"]),
            "b2": jnp.zeros((cfg["dim"],), jnp.float32),
        }
    return params


def fuse_params(params, task_configs, compute_dtype=jnp.bfloat16):
    """Fuse the per-task heads into lane-dense matrices + one packed bias tile."""
    names = list(task_configs.keys())
    dims = [task_configs[n]["dim"] for n in names]
    total_dim = sum(dims)

    H1 = params["w1"].shape[1]
    H2 = params["w2"].shape[1]
    HH = len(names) * HEAD_HIDDEN
    DP = _round_up(total_dim, 128)                 # lane-padded output width

    heads = params["heads"]
    wh1 = jnp.concatenate([heads[n]["w1"] for n in names], axis=1)      # (H2, HH)
    bh1 = jnp.concatenate([heads[n]["b1"] for n in names], axis=0)      # (HH,)

    wh2 = jnp.zeros((HH, DP), jnp.float32)                              # block-diagonal
    bh2 = jnp.zeros((DP,), jnp.float32)
    off = 0
    for t, n in enumerate(names):
        d = task_configs[n]["dim"]
        wh2 = wh2.at[t * HEAD_HIDDEN:(t + 1) * HEAD_HIDDEN, off:off + d].set(heads[n]["w2"])
        bh2 = bh2.at[off:off + d].set(heads[n]["b2"])
        off += d

    BW = _round_up(max(H1, H2, HH, DP), 128)
    bias_pack = jnp.zeros((4, BW), jnp.float32)
    bias_pack = bias_pack.at[0, :H1].set(params["b1"])
    bias_pack = bias_pack.at[1, :H2].set(params["b2"])
    bias_pack = bias_pack.at[2, :HH].set(bh1)
    bias_pack = bias_pack.at[3, :DP].set(bh2)

    return {
        "w1": params["w1"].astype(compute_dtype),
        "w2": params["w2"].astype(compute_dtype),
        "wh1": wh1.astype(compute_dtype),
        "wh2": wh2.astype(compute_dtype),
        "bias_pack": bias_pack,            # stays f32 (post-matmul math is f32)
        "total_dim": total_dim,
    }


# ----------------------------------------------------------------------------- reference
def reference_forward(x, params, task_configs):
    h = jnp.maximum(x @ params["w1"] + params["b1"], 0.0)
    h = jnp.maximum(h @ params["w2"] + params["b2"], 0.0)
    outputs = {}
    for name, cfg in task_configs.items():
        p = params["heads"][name]
        r = jnp.maximum(h @ p["w1"] + p["b1"], 0.0)
        r = r @ p["w2"] + p["b2"]
        act = cfg["activation"]
        if act == "relu":
            outputs[name] = jnp.maximum(r, 0.0)
        elif act == "tanh":
            outputs[name] = jnp.tanh(r)
        elif act == "softmax":
            outputs[name] = jax.nn.softmax(r, axis=-1)
        else:
            outputs[name] = r
    return outputs


# ----------------------------------------------------------------------------- main
if __name__ == "__main__":
    key = jax.random.PRNGKey(0)
    k_x, k_p = jax.random.split(key)

    batch = 128
    input_dim = 96
    shared_hidden_dim = 256          # module default: 256 -> 128 trunk, 64 head hidden
    task_configs = DEFAULT_TASK_CONFIGS

    x = jax.random.normal(k_x, (batch, input_dim), jnp.float32)
    params = init_params(k_p, input_dim, shared_hidden_dim, task_configs)
    fused = fuse_params(params, task_configs)

    # Default block_batch -> TB is capped at ceil(B/2)=64, so grid=(2,): exercises
    # the batch-tiled pipeline and the >=2-step rule for v7x megacore sharding.
    outs = multitask_decoder_forward(x, fused, task_configs)
    outs = jax.block_until_ready(outs)

    refs = reference_forward(x, params, task_configs)
    for name, cfg in task_configs.items():
        assert outs[name].shape == (batch, cfg["dim"]), name
        # bf16 weights/activations + bf16 output slab with f32 accumulation
        # -> relaxed tolerance vs f32 reference.
        assert jnp.allclose(outs[name], refs[name], atol=5e-2, rtol=5e-2), name
    # softmax head must be a distribution (computed in f32 in the wrapper)
    assert jnp.allclose(jnp.sum(outs["state"], axis=-1), 1.0, atol=1e-3)

    print("KERNEL_OK")
</pallas_src>

<mosaic_0001>
module attributes {stable_mosaic.version = 11 : i64} {
  func.func @_fused_decoder_kernel(%arg0: i32, %arg1: memref<64x96xf32, #tpu.memory_space<vmem>>, %arg2: memref<96x256xbf16, #tpu.memory_space<vmem>>, %arg3: memref<256x128xbf16, #tpu.memory_space<vmem>>, %arg4: memref<128x256xbf16, #tpu.memory_space<vmem>>, %arg5: memref<256x128xbf16, #tpu.memory_space<vmem>>, %arg6: memref<4x256xf32, #tpu.memory_space<vmem>>, %arg7: memref<64x128xbf16, #tpu.memory_space<vmem>>) attributes {dimension_semantics = [#tpu.dimension_semantics<parallel>], iteration_bounds = array<i64: 2>, scalar_prefetch = 0 : i64, scratch_operands = 0 : i64, tpu.core_type = #tpu.core_type<tc>, window_params = [{transform_indices = @transform_0, window_bounds = array<i64: 64, 96>}, {pipeline_mode = #tpu.pipeline_mode<synchronous>, transform_indices = @transform_1, window_bounds = array<i64: 96, 256>}, {pipeline_mode = #tpu.pipeline_mode<synchronous>, transform_indices = @transform_2, window_bounds = array<i64: 256, 128>}, {pipeline_mode = #tpu.pipeline_mode<synchronous>, transform_indices = @transform_3, window_bounds = array<i64: 128, 256>}, {pipeline_mode = #tpu.pipeline_mode<synchronous>, transform_indices = @transform_4, window_bounds = array<i64: 256, 128>}, {pipeline_mode = #tpu.pipeline_mode<synchronous>, transform_indices = @transform_5, window_bounds = array<i64: 4, 256>}, {transform_indices = @transform_6, window_bounds = array<i64: 64, 128>}]} {
    %c0 = arith.constant 0 : index
    %c0_0 = arith.constant 0 : index
    %0 = vector.load %arg1[%c0, %c0_0] : memref<64x96xf32, #tpu.memory_space<vmem>>, vector<64x96xf32>
    %1 = arith.truncf %0 : vector<64x96xf32> to vector<64x96xbf16>
    %c0_1 = arith.constant 0 : index
    %c0_2 = arith.constant 0 : index
    %2 = vector.load %arg2[%c0_1, %c0_2] : memref<96x256xbf16, #tpu.memory_space<vmem>>, vector<96x256xbf16>
    %cst = arith.constant dense<0.000000e+00> : vector<64x256xf32>
    %3 = tpu.matmul %1, %2, %cst {dimension_numbers = #tpu.dot_dimension_numbers<[1], [0], [0], [1], [0, 0, 1, 1], [], []>} : vector<64x96xbf16>, vector<96x256xbf16>, vector<64x256xf32> -> vector<64x256xf32>
    %c0_3 = arith.constant 0 : index
    %c0_4 = arith.constant 0 : index
    %4 = vector.load %arg6[%c0_3, %c0_4] : memref<4x256xf32, #tpu.memory_space<vmem>>, vector<1x256xf32>
    %5 = vector.broadcast %4 : vector<1x256xf32> to vector<64x256xf32>
    %6 = arith.addf %3, %5 : vector<64x256xf32>
    %cst_5 = arith.constant 0.000000e+00 : f32
    %7 = vector.broadcast %cst_5 : f32 to vector<64x256xf32>
    %8 = arith.maximumf %6, %7 : vector<64x256xf32>
    %9 = arith.truncf %8 : vector<64x256xf32> to vector<64x256xbf16>
    %c0_6 = arith.constant 0 : index
    %c0_7 = arith.constant 0 : index
    %10 = vector.load %arg3[%c0_6, %c0_7] : memref<256x128xbf16, #tpu.memory_space<vmem>>, vector<256x128xbf16>
    %cst_8 = arith.constant dense<0.000000e+00> : vector<64x128xf32>
    %11 = tpu.matmul %9, %10, %cst_8 {dimension_numbers = #tpu.dot_dimension_numbers<[1], [0], [0], [1], [0, 0, 1, 1], [], []>} : vector<64x256xbf16>, vector<256x128xbf16>, vector<64x128xf32> -> vector<64x128xf32>
    %c1 = arith.constant 1 : index
    %c0_9 = arith.constant 0 : index
    %12 = vector.load %arg6[%c1, %c0_9] : memref<4x256xf32, #tpu.memory_space<vmem>>, vector<1x128xf32>
    %13 = vector.broadcast %12 : vector<1x128xf32> to vector<64x128xf32>
    %14 = arith.addf %11, %13 : vector<64x128xf32>
    %cst_10 = arith.constant 0.000000e+00 : f32
    %15 = vector.broadcast %cst_10 : f32 to vector<64x128xf32>
    %16 = arith.maximumf %14, %15 : vector<64x128xf32>
    %17 = arith.truncf %16 : vector<64x128xf32> to vector<64x128xbf16>
    %c0_11 = arith.constant 0 : index
    %c0_12 = arith.constant 0 : index
    %18 = vector.load %arg4[%c0_11, %c0_12] : memref<128x256xbf16, #tpu.memory_space<vmem>>, vector<128x256xbf16>
    %cst_13 = arith.constant dense<0.000000e+00> : vector<64x256xf32>
    %19 = tpu.matmul %17, %18, %cst_13 {dimension_numbers = #tpu.dot_dimension_numbers<[1], [0], [0], [1], [0, 0, 1, 1], [], []>} : vector<64x128xbf16>, vector<128x256xbf16>, vector<64x256xf32> -> vector<64x256xf32>
    %c2 = arith.constant 2 : index
    %c0_14 = arith.constant 0 : index
    %20 = vector.load %arg6[%c2, %c0_14] : memref<4x256xf32, #tpu.memory_space<vmem>>, vector<1x256xf32>
    %21 = vector.broadcast %20 : vector<1x256xf32> to vector<64x256xf32>
    %22 = arith.addf %19, %21 : vector<64x256xf32>
    %cst_15 = arith.constant 0.000000e+00 : f32
    %23 = vector.broadcast %cst_15 : f32 to vector<64x256xf32>
    %24 = arith.maximumf %22, %23 : vector<64x256xf32>
    %25 = arith.truncf %24 : vector<64x256xf32> to vector<64x256xbf16>
    %c0_16 = arith.constant 0 : index
    %c0_17 = arith.constant 0 : index
    %26 = vector.load %arg5[%c0_16, %c0_17] : memref<256x128xbf16, #tpu.memory_space<vmem>>, vector<256x128xbf16>
    %cst_18 = arith.constant dense<0.000000e+00> : vector<64x128xf32>
    %27 = tpu.matmul %25, %26, %cst_18 {dimension_numbers = #tpu.dot_dimension_numbers<[1], [0], [0], [1], [0, 0, 1, 1], [], []>} : vector<64x256xbf16>, vector<256x128xbf16>, vector<64x128xf32> -> vector<64x128xf32>
    %c3 = arith.constant 3 : index
    %c0_19 = arith.constant 0 : index
    %28 = vector.load %arg6[%c3, %c0_19] : memref<4x256xf32, #tpu.memory_space<vmem>>, vector<1x128xf32>
    %29 = vector.broadcast %28 : vector<1x128xf32> to vector<64x128xf32>
    %30 = arith.addf %27, %29 : vector<64x128xf32>
    %31 = arith.truncf %30 : vector<64x128xf32> to vector<64x128xbf16>
    %c0_20 = arith.constant 0 : index
    %c0_21 = arith.constant 0 : index
    %32 = vector.load %arg7[%c0_20, %c0_21] : memref<64x128xbf16, #tpu.memory_space<vmem>>, vector<64x128xbf16>
    tpu.vector_store %arg7[%c0_20, %c0_21], %31 {strides = array<i32>} : memref<64x128xbf16, #tpu.memory_space<vmem>>, vector<64x128xbf16>,
    return
  }
  func.func @transform_0(%arg0: i32) -> (i32, i32) {
    %c0_i32 = arith.constant 0 : i32
    %c0_i32_0 = arith.constant 0 : i32
    return %arg0, %c0_i32 : i32, i32
  }
  func.func @transform_1(%arg0: i32) -> (i32, i32) {
    %c0_i32 = arith.constant 0 : i32
    %c0_i32_0 = arith.constant 0 : i32
    %c0_i32_1 = arith.constant 0 : i32
    return %c0_i32, %c0_i32_0 : i32, i32
  }
  func.func @transform_2(%arg0: i32) -> (i32, i32) {
    %c0_i32 = arith.constant 0 : i32
    %c0_i32_0 = arith.constant 0 : i32
    %c0_i32_1 = arith.constant 0 : i32
    return %c0_i32, %c0_i32_0 : i32, i32
  }
  func.func @transform_3(%arg0: i32) -> (i32, i32) {
    %c0_i32 = arith.constant 0 : i32
    %c0_i32_0 = arith.constant 0 : i32
    %c0_i32_1 = arith.constant 0 : i32
    return %c0_i32, %c0_i32_0 : i32, i32
  }
  func.func @transform_4(%arg0: i32) -> (i32, i32) {
    %c0_i32 = arith.constant 0 : i32
    %c0_i32_0 = arith.constant 0 : i32
    %c0_i32_1 = arith.constant 0 : i32
    return %c0_i32, %c0_i32_0 : i32, i32
  }
  func.func @transform_5(%arg0: i32) -> (i32, i32) {
    %c0_i32 = arith.constant 0 : i32
    %c0_i32_0 = arith.constant 0 : i32
    %c0_i32_1 = arith.constant 0 : i32
    return %c0_i32, %c0_i32_0 : i32, i32
  }
  func.func @transform_6(%arg0: i32) -> (i32, i32) {
    %c0_i32 = arith.constant 0 : i32
    %c0_i32_0 = arith.constant 0 : i32
    return %arg0, %c0_i32 : i32, i32
  }
}

</mosaic_0001>

<bundles_post_ra>
// kernel: tpu_custom_call.1
= control target key start
LH: loop header
LB: loop body
LE: loop exit
PB: predicated region body
PF: predicated region fallthrough
CT: control target
= control target key end

     0   :  { %11 = vsyncpa [#allocation3], 0  ;;  %s2091_s0 = inlined_call_operand.vmem [shape: f32[128,96], index: 0, kind: input, shape index: {}]   ;;  %s2092_s1 = inlined_call_operand.vmem [shape: bf16[96,256], index: 1, kind: input, shape index: {}]   ;;  %s2093_s2 = inlined_call_operand.vmem [shape: bf16[256,128], index: 2, kind: input, shape index: {}]   ;;  %s2094_s3 = inlined_call_operand.hbm [shape: bf16[128,256], index: 3, kind: input, shape index: {}]   ;;  %s2095_s4 = inlined_call_operand.hbm [shape: bf16[256,128], index: 4, kind: input, shape index: {}]   ;;  %s2096_s5 = inlined_call_operand.hbm [shape: f32[4,256], index: 5, kind: input, shape index: {}]   ;;  %s2097_s6 = inlined_call_operand.hbm [shape: bf16[128,128], index: 6, kind: output, shape index: {}]  }
   0x1   :  { %12 = vsyncpa [#allocation6], 0 }
   0x2   :  { %13 = vsyncpa [#allocation4], 0 }
   0x3   :  { %15 = vsyncpa [#allocation4 + $0x1], 0  ;;  %s1812_s21 = smov 0   ;;  %s1814_s22 = smov 0  }
   0x4   :  { %s1816_s23 = smov 0   ;;  %s1818_s24 = smov 0  }
   0x5 LB: > { %s1833_s25 = sadd.s32 4294967295, %s1764_s24   ;;  %s1263_s26 = sadd.s32 4294967294, %s1764_s24   ;;  %s1764_s24 = sphi %s1818_s24, %s2111_s24   ;;  %s1760_s23 = sphi %s1816_s23, %s2110_s23   ;;  %s1756_s22 = sphi %s1814_s22, %s2109_s22   ;;  %s1752_s21 = sphi %s1812_s21, %s2108_s21  }
   0x6   : > { %s1837_s27 = sadd.s32 1, %s1764_s24   ;;  %s159_s28 = sadd.s32 1, %s1760_s23 }
   0x7   : > { %s156_s29 = ssub.s32 %s1764_s24, %s1837_s27  ;;  %p169_p0 = scmp.ne.s32.totalorder %s1760_s23, %s1756_s22 }
   0x8   : > { %p157_p1 = scmp.eq.s32.totalorder %s156_s29, 0  ;;  %p170_p2 = scmp.eq.s32.totalorder %s1833_s25, 1 }
   0x9   : > { %p175_p3 = scmp.ne.s32.totalorder %s1756_s22, %s1752_s21  ;;  %p176_p4 = scmp.eq.s32.totalorder %s1263_s26, 1 }
   0xa   : > { %s1848_s30 = scalar_select %p157_p1, %s1760_s23, %s159_s28  }
   0xb   : > { %p1850_p5 = por %p170_p2, %p169_p0  ;;  %p1854_p6 = por %p176_p4, %p175_p3 }
   0xc   : > { %p1264_p7 = scmp.ge.s32.totalorder %s1764_s24, 1  ;;  %p183_p8 = scmp.lt.s32.totalorder %s1764_s24, 3 }
   0xd   : > { %s2100_s8 = scalar_select %p1854_p6, 1, 0 }
   0xe   : > { %p2098_p9 = scmp.eq.s32.totalorder %s1833_s25, 0  ;;  %p1861_p10 = pnand %p1264_p7, %p183_p8 }
   0xf   : > { %s1766_s10 = smov [#allocation5]   ;;  %s1767_s13 = smov [#allocation2]  }
  0x10   : > { %s214_s11 = sshll.u32 %s1766_s10, 4  ;;  %p1481_p11 = pneg %p1861_p10  ;;  %s215_s11 = int_to_ptr.vmem [resolvable:$true] %s214_s11 }
  0x11   : > { %s201_s14 = sshll.u32 %s1767_s13, 4  ;;  %s1629_s15 = scalar_lea.vmem %s215_s11, 2048  ;;  %s202_s14 = int_to_ptr.vmem [resolvable:$true] %s201_s14 }
  0x12   : > { %p1869_p12 = pnand %p2098_p9, %p1481_p11  ;;  %p1630_p0 = scmp.ne.s32.totalorder %s215_s11, %s1629_s15 }
  0x13   : > { %p1637_p3 = scmp.lt.s32.totalorder %s215_s11, %s215_s11  ;;  %p1638_p4 = scmp.lt.s32.totalorder %s1629_s15, %s1629_s15 }
  0x14   : > { %p1620_p13 = pneg %p1869_p12 }
  0x15   : > { %p1639_p7 = por %p1638_p4, %p1637_p3 }
  0x16   : > { %p1632_p1 = pnand %p1630_p0, %p1620_p13 }
  0x18   : > { %p1633_p2 = pneg %p1632_p1 }
  0x1a   : > { %p1640_p8 = pnand %p1639_p7, %p1633_p2 }
  0x1c   : > { %1643 = shalt.err (!%p1640_p8)
}
  0x1d   : > { %s1768_s16 = smov 64   ;;  %s1769_s17 = smov 4  }
  0x1e   : > { %1487 = dma.hbm_to_vmem [thread:$0]  (!%p1869_p12), %s2095_s4, 2048, %s215_s11, [#allocation6], %s1768_s16, %s1768_s16, %s1769_s17  }
  0x1f   : > { %s1655_s20 = scalar_lea.vmem %s202_s14, 2048  ;;  %p1663_p9 = scmp.lt.s32.totalorder %s202_s14, %s202_s14 }
  0x20   : > { %p1656_p11 = scmp.ne.s32.totalorder %s202_s14, %s1655_s20  ;;  %p1664_p6 = scmp.lt.s32.totalorder %s1655_s20, %s1655_s20 }
  0x22   : > { %p1658_p0 = pnand %p1656_p11, %p1620_p13  ;;  %p1665_p3 = por %p1664_p6, %p1663_p9 }
  0x24   : > { %p1659_p1 = pneg %p1658_p0 }
  0x26   : > { %p1666_p2 = pnand %p1665_p3, %p1659_p1 }
  0x28   : > { %1669 = shalt.err (!%p1666_p2)
}
  0x29   : > { %s1770_s26 = smov 128   ;;  %s1771_s28 = smov 8  }
  0x2a   : > { %1484 = dma.hbm_to_vmem [thread:$0]  (!%p1869_p12), %s2094_s3, 2048, %s202_s14, [#allocation3], %s1770_s26, %s1770_s26, %s1771_s28  }
  0x2b   : > { %s1772_s11 = smov [#allocation7]  }
  0x2c   : > { %s228_s13 = sshll.u32 %s1772_s11, 4  ;;  %s229_s13 = int_to_ptr.vmem [resolvable:$true] %s228_s13 }
  0x2d   : > { %s1681_s15 = scalar_lea.vmem %s229_s13, 128  ;;  %p1689_p9 = scmp.lt.s32.totalorder %s229_s13, %s229_s13 }
  0x2e   : > { %p1682_p4 = scmp.ne.s32.totalorder %s229_s13, %s1681_s15  ;;  %p1690_p8 = scmp.lt.s32.totalorder %s1681_s15, %s1681_s15 }
  0x30   : > { %p1684_p7 = pnand %p1682_p4, %p1620_p13  ;;  %p1691_p11 = por %p1690_p8, %p1689_p9 }
  0x32   : > { %p1685_p6 = pneg %p1684_p7 }
  0x34   : > { %p1692_p0 = pnand %p1691_p11, %p1685_p6 }
  0x36   : > { %1695 = shalt.err (!%p1692_p0)
}
  0x37   : > { %1490 = dma.hbm_to_vmem [thread:$0]  (!%p1869_p12), %s2096_s5, 128, %s229_s13, [#allocation6]  }
  0x38   : > { %250 = sbr.rel (%p1861_p10) target bundleno = 952 (0x3b8), region = 44  ;;  %p2103_p1 = scmp.eq.s32.totalorder (!%p1861_p10), %s1833_s25, 0 }
  0x3d   : > { %1739 = dma.done.wait (%p2103_p1), [#allocation3], 2048   ;;  %p2104_p13 = pmov %p2103_p1 }
  0x3e   : > { %p2105_p3 = pmov %p2103_p1 }
  0x3f   : > { %1741 = vsyncadd (%p2104_p13), [#allocation3], 4294965248 }
  0x40   : > { %1743 = dma.done.wait (%p2105_p3), [#allocation6], 2176   ;;  %p2106_p2 = pmov %p2103_p1 }
  0x41   : > { %v1773_v0 = vmov 0   ;;  %v1544_v1 = vld [vmem:[%s2092_s1 + $0x54] ss:$8 sps:$4 sm:$0xff]   ;;  %s1274_s9 = sshll.u32 %s1833_s25, 3  ;;  %v1546_v2 = vld [vmem:[%s2092_s1 + $0x50] ss:$8 sps:$4 sm:$0xff]   ;;  %v322_v51 = vlaneseq }
  0x42   : > { %1745 = vsyncadd (%p2106_p2), [#allocation6], 4294965120  ;;  %437 = vmatprep.mubr.bf16.mxu0 %v1773_v0  ;;  %409 = vmatprep.subr.bf16.mxu0 %v1544_v1  ;;  %v1547_v3 = vld [vmem:[%s2092_s1 + $0x44] ss:$8 sps:$4 sm:$0xff]   ;;  %v1549_v4 = vld [vmem:[%s2092_s1 + $0x40] ss:$8 sps:$4 sm:$0xff]  }
  0x43   : > { %410 = vmatpush1.bf16.msra.mxu0 %v1546_v2  ;;  %p289_p10 = scmp.lt.s32.totalorder %s1274_s9, 15  ;;  %v1550_v5 = vld [vmem:[%s2092_s1 + $0x34] ss:$8 sps:$4 sm:$0xff]   ;;  %v1552_v6 = vld [vmem:[%s2092_s1 + $0x30] ss:$8 sps:$4 sm:$0xff]   ;;  %v1566_v15 = vld [vmem:[%s2093_s2 + $0x68] sm:$0xff]  }
  0x44   : > { %411 = vmatprep.subr.bf16.mxu0 %v1547_v3  ;;  %v1553_v7 = vld [vmem:[%s2092_s1 + $0x24] ss:$8 sps:$4 sm:$0xff]   ;;  %v1555_v8 = vld [vmem:[%s2092_s1 + $0x20] ss:$8 sps:$4 sm:$0xff]   ;;  %v1556_v9 = vld [vmem:[%s2092_s1 + $0x14] ss:$8 sps:$4 sm:$0xff]  }
  0x45   : > { %s2113_s9 = smov (!%p289_p10, %s1274_s9), 15  ;;  %v1562_v10 = vld [vmem:[%s2093_s2 + $0x78] sm:$0xff]   ;;  %v1564_v13 = vld [vmem:[%s2093_s2 + $0x70] sm:$0xff]   ;;  %v1559_v16 = vld [vmem:[%s2092_s1 + $0x4] ss:$8 sps:$4 sm:$0xff]   ;;  %vm392_vm0 = vcmask 785408  }
  0x46   : > { %s1275_s20 = sshll.u32 %s2113_s9, 3  ;;  %v1563_v11 = vld [vmem:[%s2093_s2 + $0x38] sm:$0xff]   ;;  %1387 = vmatprep.subr.bf16.mxu1 %v1562_v10  ;;  %v1565_v14 = vld [vmem:[%s2093_s2 + $0x30] sm:$0xff]   ;;  %v1561_v17 = vld [vmem:[%s2092_s1] ss:$8 sps:$4 sm:$0xff]   ;;  %v2016_v52 = vshrl.u32 %v322_v51, 7 }
  0x47   : > { %412 = vmatpush1.bf16.msra.mxu0 %v1549_v4  ;;  %v1558_v12 = vld [vmem:[%s2092_s1 + $0x10] ss:$8 sps:$4 sm:$0xff]   ;;  %s1953_s12 = scalar_lea.vmem %s2091_s0, %s1275_s20  ;;  %1388 = vmatpush3.bf16.msra.mxu1 %v1563_v11  ;;  %v1567_v20 = vld [vmem:[%s2093_s2 + $0x28] sm:$0xff]   ;;  %v1568_v21 = vld [vmem:[%s2093_s2 + $0x60] sm:$0xff]   ;;  %s285_s18 = sand.u32 1, %s1756_s22  }
  0x48   : > { %413 = vmatprep.subr.bf16.mxu0 %v1550_v5  ;;  %1389 = vmatprep.subr.bf16.mxu1 %v1564_v13  ;;  %v296_v18 = vld [vmem:[%s1953_s12] sm:$0xff]  ;;  %v297_v19 = vld [vmem:[%s1953_s12 + $0x8] sm:$0xff]  ;;  %v1570_v23 = vld [vmem:[%s2093_s2 + $0x58] sm:$0xff]   ;;  %v328_v53 = vsub.s32 1, %v2016_v52  ;;  %v324_v54 = vsub.s32 0, %v2016_v52  ;;  %s1273_s19 = sshll.u32 %s285_s18, 5 }
  0x49   : > { %v1569_v22 = vld [vmem:[%s2093_s2 + $0x20] sm:$0xff]   ;;  %v304_v24 = vpack.c.bf16 %v297_v19, %v296_v18  ;;  %v1571_v25 = vld [vmem:[%s2093_s2 + $0x18] sm:$0xff]   ;;  %v298_v26 = vld [vmem:[%s1953_s12 + $0x10] sm:$0xff]  ;;  %s2034_s26 = scalar_lea.vmem [#allocation8], %s1273_s19  ;;  %s1363_s29 = sshll.u32 %s1833_s25, 9 }
  0x4a   : > { %v299_v27 = vld [vmem:[%s1953_s12 + $0x18] sm:$0xff]  ;;  %v300_v29 = vld [vmem:[%s1953_s12 + $0x20] sm:$0xff]  ;;  %v301_v30 = vld [vmem:[%s1953_s12 + $0x28] sm:$0xff]  ;;  %s1170_s28 = sshll.u32 %s2034_s26, 4  ;;  %s2046_s11 = scalar_lea.hbm %s2097_s6, %s1363_s29  ;;  %s2041_s28 = int_to_ptr.vmem [resolvable:$true] %s1170_s28 }
  0x4b   : > { %414 = vmatpush1.bf16.msra.mxu0 %v1552_v6  ;;  %1390 = vmatpush3.bf16.msra.mxu1 %v1565_v14  ;;  %v305_v28 = vpack.c.bf16 %v299_v27, %v298_v26  ;;  %v306_v31 = vpack.c.bf16 %v301_v30, %v300_v29  ;;  %v302_v32 = vld [vmem:[%s1953_s12 + $0x30] sm:$0xff]  ;;  %v303_v33 = vld [vmem:[%s1953_s12 + $0x38] sm:$0xff]  ;;  %v1574_v37 = vld [vmem:[%s2093_s2 + $0x48] sm:$0xff]   ;;  %s2051_s13 = scalar_lea.sflag [#allocation4], %s285_s18  ;;  %s1696_s12 = scalar_lea.vmem %s2041_s28, 512 }
  0x4c   : > { %415 = vmatprep.subr.bf16.mxu0 %v1553_v7  ;;  %1391 = vmatprep.subr.bf16.mxu1 %v1566_v15  ;;  %v307_v34 = vpack.c.bf16 %v303_v33, %v302_v32  ;;  %v1572_v35 = vld [vmem:[%s2093_s2 + $0x50] sm:$0xff]   ;;  %v1575_v38 = vld [vmem:[%s2093_s2 + $0x8] sm:$0xff]   ;;  %v1576_v39 = vld [vmem:[%s2093_s2 + $0x40] sm:$0xff]   ;;  %p1697_p12 = scmp.ne.s32.totalorder %s2041_s28, %s1696_s12  ;;  %s1774_s25 = smov [#allocation8]  }
  0x4d   : > { %v1573_v36 = vld [vmem:[%s2093_s2 + $0x10] sm:$0xff]   ;;  %v1577_v40 = vld [vmem:[%s2093_s2] sm:$0xff]   ;;  %s1700_s15 = sshll.u32 %s1774_s25, 4  ;;  %s1701_s15 = int_to_ptr.vmem [resolvable:$false] %s1700_s15 }
  0x4e   : > { %v1578_v41 = vld [vmem:[#allocation2 + $0x70] ss:$8 sps:$4 sm:$0xff]   ;;  %v1580_v42 = vld [vmem:[#allocation2 + $0x74] ss:$8 sps:$4 sm:$0xff]   ;;  %v1583_v43 = vld [vmem:[#allocation2 + $0x64] ss:$8 sps:$4 sm:$0xff]   ;;  %p1698_p4 = pnand %p1697_p12, %p1850_p5  ;;  %p1703_p6 = scmp.lt.s32.totalorder %s2041_s28, %s1701_s15 }
  0x4f   : > { %416 = vmatpush1.bf16.msra.mxu0 %v1555_v8  ;;  %1392 = vmatpush3.bf16.msra.mxu1 %v1567_v20  ;;  %v1581_v44 = vld [vmem:[#allocation2 + $0x60] ss:$8 sps:$4 sm:$0xff]   ;;  %v1586_v45 = vld [vmem:[#allocation2 + $0x54] ss:$8 sps:$4 sm:$0xff]   ;;  %v1584_v46 = vld [vmem:[#allocation2 + $0x50] ss:$8 sps:$4 sm:$0xff]  }
  0x50   : > { %417 = vmatprep.subr.bf16.mxu0 %v1556_v9  ;;  %1393 = vmatprep.subr.bf16.mxu1 %v1568_v21  ;;  %v1589_v47 = vld [vmem:[#allocation2 + $0x44] ss:$8 sps:$4 sm:$0xff]   ;;  %v1587_v48 = vld [vmem:[#allocation2 + $0x40] ss:$8 sps:$4 sm:$0xff]   ;;  %v1592_v49 = vld [vmem:[#allocation2 + $0x34] ss:$8 sps:$4 sm:$0xff]   ;;  %p1699_p7 = pneg %p1698_p4 }
  0x51   : > { %v1590_v50 = vld [vmem:[#allocation2 + $0x30] ss:$8 sps:$4 sm:$0xff]   ;;  %v320_v55 = vld [vmem:[#allocation7] ss:$4 sm:$0x3]  ;;  %s1702_s16 = scalar_lea.vmem %s1701_s15, 1024 }
  0x52   : > { %v329_v57 = vrot.slane %v320_v55, %v328_v53  ;;  %v325_v58 = vrot.slane %v320_v55, %v324_v54  ;;  %v1595_v51 = vld [vmem:[#allocation2 + $0x24] ss:$8 sps:$4 sm:$0xff]   ;;  %v1593_v55 = vld [vmem:[#allocation2 + $0x20] ss:$8 sps:$4 sm:$0xff]   ;;  %p1704_p9 = scmp.lt.s32.totalorder %s1702_s16, %s1696_s12 }
  0x53   : > { %418 = vmatpush1.bf16.msra.mxu0 %v1558_v12  ;;  %1394 = vmatpush3.bf16.msra.mxu1 %v1569_v22 }
  0x54   : > { %419 = vmatprep.subr.bf16.mxu0 %v1559_v16  ;;  %1395 = vmatprep.subr.bf16.mxu1 %v1570_v23  ;;  %p1705_p8 = por %p1704_p9, %p1703_p6 }
  0x56   : > { %p1706_p11 = pnand %p1705_p8, %p1699_p7 }
  0x57   : > { %420 = vmatpush1.bf16.msra.mxu0 %v1561_v17  ;;  %1396 = vmatpush3.bf16.msra.mxu1 %v1571_v25 }
  0x58   : > { %1397 = vmatprep.subr.bf16.mxu1 %v1572_v35  ;;  %821 = vmatprep.subr.bf16.mxu0 %v1580_v42 }
  0x5a   : > { %1288 = vmatmul.mubr.msk.bf16.vlgmr.msra.gmra.mxu0 %vm392_vm0, %v304_v24 }
  0x5b   : > { %447 = vmatprep.mubr.bf16.mxu0 %v1773_v0  ;;  %1398 = vmatpush3.bf16.msra.mxu1 %v1573_v36 }
  0x5c   : > { %1399 = vmatprep.subr.bf16.mxu1 %v1574_v37  ;;  %822 = vmatpush1.bf16.msra.mxu0 %v1578_v41 }
  0x5d   : > { %823 = vmatprep.subr.bf16.mxu0 %v1583_v43 }
  0x5f   : > { %1400 = vmatpush3.bf16.msra.mxu1 %v1575_v38 }
  0x60   : > { %1401 = vmatprep.subr.bf16.mxu1 %v1576_v39  ;;  %824 = vmatpush1.bf16.msra.mxu0 %v1581_v44 }
  0x61   : > { %825 = vmatprep.subr.bf16.mxu0 %v1586_v45 }
  0x62   : > { %1289 = vmatmul.mubr.msk.bf16.gmra.mxu0 %vm392_vm0, %v305_v28 }
  0x63   : > { %457 = vmatprep.mubr.bf16.mxu0 %v1773_v0  ;;  %1402 = vmatpush3.bf16.msra.mxu1 %v1577_v40 }
  0x64   : > { %826 = vmatpush1.bf16.msra.mxu0 %v1584_v46 }
  0x65   : > { %827 = vmatprep.subr.bf16.mxu0 %v1589_v47 }
  0x68   : > { %828 = vmatpush1.bf16.msra.mxu0 %v1587_v48 }
  0x69   : > { %829 = vmatprep.subr.bf16.mxu0 %v1592_v49 }
  0x6a   : > { %1290 = vmatmul.mubr.msk.bf16.gmra.mxu0 %vm392_vm0, %v306_v31 }
  0x6b   : > { %467 = vmatprep.mubr.bf16.mxu0 %v1773_v0 }
  0x6c   : > { %830 = vmatpush1.bf16.msra.mxu0 %v1590_v50 }
  0x6d   : > { %831 = vmatprep.subr.bf16.mxu0 %v1595_v51 }
  0x70   : > { %832 = vmatpush1.bf16.msra.mxu0 %v1593_v55  ;;  %v1612_v55 = vld [vmem:[#allocation5 + $0x50] sm:$0xff]  }
  0x72   : > { %1291 = vmatmul.mubr.msk.bf16.gmra.mxu0 %vm392_vm0, %v307_v34 }
  0x73   : > { %853 = vmatprep.mubr.bf16.mxu0 %v1773_v0 }
 0x11a   : > { %v439_v56 = vpop.f32.mrf.mxu0 }
 0x11b   : > { %v440_v63 = vadd.f32 %v439_v56, %v325_v58  ;;  %v1598_v56 = vld [vmem:[#allocation2 + $0x14] ss:$8 sps:$4 sm:$0xff]  }
 0x11c   : > { %v441_v59 = vpop.f32.mrf.mxu0  ;;  %833 = vmatprep.subr.bf16.mxu0 %v1598_v56  ;;  %v1613_v56 = vld [vmem:[#allocation5 + $0x10] sm:$0xff]  }
 0x11d   : > { %v442_v61 = vadd.f32 %v441_v59, %v329_v57  ;;  %v478_v7 = vmax.f32 %v440_v63, 0.0  ;;  %v1596_v59 = vld [vmem:[#allocation2 + $0x10] ss:$8 sps:$4 sm:$0xff]  }
 0x11e   : > { %v443_v60 = vpop.f32.mrf.mxu0  ;;  %834 = vmatpush1.bf16.msra.mxu0 %v1596_v59  ;;  %v1605_v63 = vld [vmem:[#allocation5 + $0x30] sm:$0xff]   ;;  %v1614_v59 = vld [vmem:[#allocation5 + $0x48] sm:$0xff]  }
 0x11f   : > { %v444_v62 = vadd.f32 %v443_v60, %v325_v58  ;;  %v479_v5 = vmax.f32 %v442_v61, 0.0  ;;  %v1599_v60 = vld [vmem:[#allocation2] ss:$8 sps:$4 sm:$0xff]   ;;  %v1603_v61 = vld [vmem:[#allocation5 + $0x38] sm:$0xff]  }
 0x120   : > { %v445_v1 = vpop.f32.mrf.mxu0 }
 0x121   : > { %v446_v2 = vadd.f32 %v445_v1, %v329_v57  ;;  %v480_v3 = vmax.f32 %v444_v62, 0.0  ;;  %v1604_v62 = vld [vmem:[#allocation5 + $0x70] sm:$0xff]   ;;  %v1606_v1 = vld [vmem:[#allocation5 + $0x68] sm:$0xff]  }
 0x122   : > { %v449_v4 = vpop.f32.mrf.mxu0 }
 0x123   : > { %v481_v6 = vmax.f32 %v446_v2, 0.0  ;;  %v494_v10 = vpack.c.bf16 %v480_v3, %v478_v7  ;;  %v450_v14 = vadd.f32 %v449_v4, %v325_v58  ;;  %v1607_v2 = vld [vmem:[#allocation5 + $0x28] sm:$0xff]   ;;  %v1608_v3 = vld [vmem:[#allocation5 + $0x60] sm:$0xff]  }
 0x124   : > { %v451_v8 = vpop.f32.mrf.mxu0  ;;  %v1609_v4 = vld [vmem:[#allocation5 + $0x20] sm:$0xff]  }
 0x125   : > { %v495_v9 = vpack.c.bf16 %v481_v6, %v479_v5  ;;  %v452_v12 = vadd.f32 %v451_v8, %v329_v57  ;;  %v482_v21 = vmax.f32 %v450_v14, 0.0  ;;  %v1610_v5 = vld [vmem:[#allocation5 + $0x58] sm:$0xff]  }
 0x126   : > { %v453_v11 = vpop.f32.mrf.mxu0  ;;  %v1611_v6 = vld [vmem:[#allocation5 + $0x18] sm:$0xff]  }
 0x127   : > { %v454_v13 = vadd.f32 %v453_v11, %v325_v58  ;;  %667 = vmatprep.mubr.bf16.mxu1 %v495_v9  ;;  %v483_v19 = vmax.f32 %v452_v12, 0.0 }
 0x128   : > { %v455_v15 = vpop.f32.mrf.mxu0  ;;  %668 = vmatmul.mubr.bf16.vlgmr.msra.gmra.mxu1 %v494_v10  ;;  %v1292_v10 = vld [vmem:[#allocation7 + $0x1] ss:$0 sm:$0xff] }
 0x129   : > { %v456_v16 = vadd.f32 %v455_v15, %v329_v57  ;;  %v484_v17 = vmax.f32 %v454_v13, 0.0 }
 0x12a   : > { %v459_v18 = vpop.f32.mrf.mxu0 }
 0x12b   : > { %v485_v20 = vmax.f32 %v456_v16, 0.0  ;;  %v496_v24 = vpack.c.bf16 %v484_v17, %v482_v21  ;;  %v460_v28 = vadd.f32 %v459_v18, %v325_v58 }
 0x12c   : > { %v461_v22 = vpop.f32.mrf.mxu0 }
 0x12d   : > { %v497_v23 = vpack.c.bf16 %v485_v20, %v483_v19  ;;  %v462_v26 = vadd.f32 %v461_v22, %v329_v57  ;;  %v486_v35 = vmax.f32 %v460_v28, 0.0 }
 0x12e   : > { %v463_v25 = vpop.f32.mrf.mxu0 }
 0x12f   : > { %v464_v27 = vadd.f32 %v463_v25, %v325_v58  ;;  %675 = vmatprep.mubr.bf16.mxu1 %v497_v23  ;;  %v487_v33 = vmax.f32 %v462_v26, 0.0 }
 0x130   : > { %v465_v29 = vpop.f32.mrf.mxu0  ;;  %676 = vmatmul.mubr.bf16.gmra.mxu1 %v496_v24 }
 0x131   : > { %v466_v30 = vadd.f32 %v465_v29, %v329_v57  ;;  %v488_v31 = vmax.f32 %v464_v27, 0.0 }
 0x132   : > { %v469_v32 = vpop.f32.mrf.mxu0 }
 0x133   : > { %v489_v34 = vmax.f32 %v466_v30, 0.0  ;;  %v498_v38 = vpack.c.bf16 %v488_v31, %v486_v35  ;;  %v470_v42 = vadd.f32 %v469_v32, %v325_v58 }
 0x134   : > { %v471_v36 = vpop.f32.mrf.mxu0 }
 0x135   : > { %v499_v37 = vpack.c.bf16 %v489_v34, %v487_v33  ;;  %v472_v40 = vadd.f32 %v471_v36, %v329_v57  ;;  %v490_v48 = vmax.f32 %v470_v42, 0.0 }
 0x136   : > { %v473_v39 = vpop.f32.mrf.mxu0 }
 0x137   : > { %v474_v41 = vadd.f32 %v473_v39, %v325_v58  ;;  %683 = vmatprep.mubr.bf16.mxu1 %v499_v37  ;;  %v491_v46 = vmax.f32 %v472_v40, 0.0  ;;  %v1601_v58 = vld [vmem:[#allocation2 + $0x4] ss:$8 sps:$4 sm:$0xff]  }
 0x138   : > { %v475_v43 = vpop.f32.mrf.mxu0  ;;  %684 = vmatmul.mubr.bf16.gmra.mxu1 %v498_v38  ;;  %835 = vmatprep.subr.bf16.mxu0 %v1601_v58  ;;  %v1615_v58 = vld [vmem:[#allocation5 + $0x8] sm:$0xff]  }
 0x139   : > { %v476_v44 = vadd.f32 %v475_v43, %v329_v57  ;;  %v492_v45 = vmax.f32 %v474_v41, 0.0  ;;  %836 = vmatpush1.bf16.msra.mxu0 %v1599_v60  ;;  %v1602_v57 = vld [vmem:[#allocation5 + $0x78] sm:$0xff]   ;;  %v1616_v60 = vld [vmem:[#allocation5 + $0x40] sm:$0xff]  }
 0x13a   : > { %1427 = vmatprep.subr.bf16.mxu1 %v1602_v57  ;;  %v1617_v57 = vld [vmem:[#allocation5] sm:$0xff]  }
 0x13b   : > { %v493_v47 = vmax.f32 %v476_v44, 0.0  ;;  %v500_v50 = vpack.c.bf16 %v492_v45, %v490_v48  ;;  %1428 = vmatpush3.bf16.msra.mxu1 %v1603_v61  ;;  %v729_v61 = vld [vmem:[#allocation7 + $0x2] ss:$4 sm:$0x3] }
 0x13c   : > { %1429 = vmatprep.subr.bf16.mxu1 %v1604_v62 }
 0x13d   : > { %v501_v49 = vpack.c.bf16 %v493_v47, %v491_v46 }
 0x13f   : > { %691 = vmatprep.mubr.bf16.mxu1 %v501_v49  ;;  %1430 = vmatpush3.bf16.msra.mxu1 %v1605_v63  ;;  %v734_v63 = vrot.slane %v729_v61, %v324_v54 }
 0x140   : > { %692 = vmatmul.mubr.bf16.gmra.mxu1 %v500_v50  ;;  %1431 = vmatprep.subr.bf16.mxu1 %v1606_v1 }
 0x143   : > { %1432 = vmatpush3.bf16.msra.mxu1 %v1607_v2 }
 0x144   : > { %1433 = vmatprep.subr.bf16.mxu1 %v1608_v3 }
 0x147   : > { %1434 = vmatpush3.bf16.msra.mxu1 %v1609_v4 }
 0x148   : > { %1435 = vmatprep.subr.bf16.mxu1 %v1610_v5 }
 0x14b   : > { %1436 = vmatpush3.bf16.msra.mxu1 %v1611_v6 }
 0x14c   : > { %1437 = vmatprep.subr.bf16.mxu1 %v1612_v55 }
 0x14f   : > { %1438 = vmatpush3.bf16.msra.mxu1 %v1613_v56 }
 0x150   : > { %1439 = vmatprep.subr.bf16.mxu1 %v1614_v59 }
 0x153   : > { %1440 = vmatpush3.bf16.msra.mxu1 %v1615_v58 }
 0x154   : > { %1441 = vmatprep.subr.bf16.mxu1 %v1616_v60 }
 0x157   : > { %1442 = vmatpush3.bf16.msra.mxu1 %v1617_v57  ;;  %v1325_v57 = vld [vmem:[#allocation7 + $0x3] ss:$0 sm:$0xff] }
 0x1e8   : > { %v1403_v7 = vpop.f32.mrf.mxu1 }
 0x1ea   : > { %v1404_v8 = vpop.f32.mrf.mxu1 }
 0x1eb   : > { %v1405_v9 = vadd.f32 %v1404_v8, %v1403_v7 }
 0x1ec   : > { %v1406_v11 = vpop.f32.mrf.mxu1 }
 0x1ed   : > { %v670_v13 = vadd.f32 %v1405_v9, %v1292_v10 }
 0x1ee   : > { %v1407_v12 = vpop.f32.mrf.mxu1 }
 0x1ef   : > { %v1408_v14 = vadd.f32 %v1407_v12, %v1406_v11  ;;  %v700_v18 = vmax.f32 %v670_v13, 0.0 }
 0x1f0   : > { %v1409_v15 = vpop.f32.mrf.mxu1 }
 0x1f1   : > { %v673_v16 = vadd.f32 %v1408_v14, %v1292_v10 }
 0x1f2   : > { %v1410_v17 = vpop.f32.mrf.mxu1 }
 0x1f3   : > { %v701_v19 = vmax.f32 %v673_v16, 0.0  ;;  %v1411_v20 = vadd.f32 %v1410_v17, %v1409_v15 }
 0x1f4   : > { %v1412_v21 = vpop.f32.mrf.mxu1 }
 0x1f5   : > { %v708_v22 = vpack.c.bf16 %v701_v19, %v700_v18  ;;  %v678_v24 = vadd.f32 %v1411_v20, %v1292_v10 }
 0x1f6   : > { %v1413_v23 = vpop.f32.mrf.mxu1 }
 0x1f7   : > { %v1414_v25 = vadd.f32 %v1413_v23, %v1412_v21  ;;  %854 = vmatmul.mubr.bf16.vlgmr.msra.gmra.mxu0 %v708_v22  ;;  %v702_v29 = vmax.f32 %v678_v24, 0.0 }
 0x1f8   : > { %v1415_v26 = vpop.f32.mrf.mxu1  ;;  %863 = vmatprep.mubr.bf16.mxu0 %v1773_v0 }
 0x1f9   : > { %v681_v27 = vadd.f32 %v1414_v25, %v1292_v10 }
 0x1fa   : > { %v1416_v28 = vpop.f32.mrf.mxu1 }
 0x1fb   : > { %v703_v30 = vmax.f32 %v681_v27, 0.0  ;;  %v1417_v31 = vadd.f32 %v1416_v28, %v1415_v26 }
 0x1fc   : > { %v1418_v32 = vpop.f32.mrf.mxu1 }
 0x1fd   : > { %v709_v33 = vpack.c.bf16 %v703_v30, %v702_v29  ;;  %v686_v35 = vadd.f32 %v1417_v31, %v1292_v10 }
 0x1fe   : > { %v1419_v34 = vpop.f32.mrf.mxu1 }
 0x1ff   : > { %v1420_v36 = vadd.f32 %v1419_v34, %v1418_v32  ;;  %864 = vmatmul.mubr.bf16.gmra.mxu0 %v709_v33  ;;  %v704_v40 = vmax.f32 %v686_v35, 0.0 }
 0x200   : > { %v1421_v37 = vpop.f32.mrf.mxu1  ;;  %873 = vmatprep.mubr.bf16.mxu0 %v1773_v0 }
 0x201   : > { %v689_v38 = vadd.f32 %v1420_v36, %v1292_v10 }
 0x202   : > { %v1422_v39 = vpop.f32.mrf.mxu1 }
 0x203   : > { %v705_v41 = vmax.f32 %v689_v38, 0.0  ;;  %v1423_v42 = vadd.f32 %v1422_v39, %v1421_v37 }
 0x204   : > { %v1424_v43 = vpop.f32.mrf.mxu1 }
 0x205   : > { %v710_v44 = vpack.c.bf16 %v705_v41, %v704_v40  ;;  %v694_v46 = vadd.f32 %v1423_v42, %v1292_v10 }
 0x206   : > { %v1425_v45 = vpop.f32.mrf.mxu1 }
 0x207   : > { %v1426_v47 = vadd.f32 %v1425_v45, %v1424_v43  ;;  %874 = vmatmul.mubr.bf16.gmra.mxu0 %v710_v44  ;;  %v706_v49 = vmax.f32 %v694_v46, 0.0 }
 0x208   : > { %883 = vmatprep.mubr.bf16.mxu0 %v1773_v0  ;;  %v738_v0 = vrot.slane %v729_v61, %v328_v53 }
 0x209   : > { %v697_v48 = vadd.f32 %v1426_v47, %v1292_v10 }
 0x20b   : > { %v707_v50 = vmax.f32 %v697_v48, 0.0 }
 0x20d   : > { %v711_v51 = vpack.c.bf16 %v707_v50, %v706_v49 }
 0x20f   : > { %884 = vmatmul.mubr.bf16.gmra.mxu0 %v711_v51 }
 0x2b7   : > { %v855_v62 = vpop.f32.mrf.mxu0 }
 0x2b8   : > { %v856_v5 = vadd.f32 %v855_v62, %v734_v63 }
 0x2b9   : > { %v857_v1 = vpop.f32.mrf.mxu0 }
 0x2ba   : > { %v858_v3 = vadd.f32 %v857_v1, %v738_v0  ;;  %v894_v12 = vmax.f32 %v856_v5, 0.0 }
 0x2bb   : > { %v859_v2 = vpop.f32.mrf.mxu0 }
 0x2bc   : > { %v860_v4 = vadd.f32 %v859_v2, %v734_v63  ;;  %v895_v10 = vmax.f32 %v858_v3, 0.0 }
 0x2bd   : > { %v861_v6 = vpop.f32.mrf.mxu0 }
 0x2be   : > { %v862_v7 = vadd.f32 %v861_v6, %v738_v0  ;;  %v896_v8 = vmax.f32 %v860_v4, 0.0 }
 0x2bf   : > { %v865_v9 = vpop.f32.mrf.mxu0 }
 0x2c0   : > { %v897_v11 = vmax.f32 %v862_v7, 0.0  ;;  %v910_v15 = vpack.c.bf16 %v896_v8, %v894_v12  ;;  %v866_v52 = vadd.f32 %v865_v9, %v734_v63 }
 0x2c1   : > { %v867_v13 = vpop.f32.mrf.mxu0 }
 0x2c2   : > { %v911_v14 = vpack.c.bf16 %v897_v11, %v895_v10  ;;  %v868_v53 = vadd.f32 %v867_v13, %v738_v0  ;;  %v898_v23 = vmax.f32 %v866_v52, 0.0 }
 0x2c3   : > { %v869_v16 = vpop.f32.mrf.mxu0 }
 0x2c4   : > { %v870_v17 = vadd.f32 %v869_v16, %v734_v63  ;;  %1083 = vmatprep.mubr.bf16.mxu1 %v911_v14  ;;  %v899_v21 = vmax.f32 %v868_v53, 0.0 }
 0x2c5   : > { %v871_v54 = vpop.f32.mrf.mxu0  ;;  %1084 = vmatmul.mubr.bf16.vlgmr.msra.gmra.mxu1 %v910_v15 }
 0x2c6   : > { %v872_v18 = vadd.f32 %v871_v54, %v738_v0  ;;  %v900_v19 = vmax.f32 %v870_v17, 0.0 }
 0x2c7   : > { %v875_v20 = vpop.f32.mrf.mxu0 }
 0x2c8   : > { %v901_v22 = vmax.f32 %v872_v18, 0.0  ;;  %v912_v26 = vpack.c.bf16 %v900_v19, %v898_v23  ;;  %v876_v30 = vadd.f32 %v875_v20, %v734_v63 }
 0x2c9   : > { %v877_v24 = vpop.f32.mrf.mxu0 }
 0x2ca   : > { %v913_v25 = vpack.c.bf16 %v901_v22, %v899_v21  ;;  %v878_v28 = vadd.f32 %v877_v24, %v738_v0  ;;  %v902_v37 = vmax.f32 %v876_v30, 0.0 }
 0x2cb   : > { %v879_v27 = vpop.f32.mrf.mxu0 }
 0x2cc   : > { %v880_v29 = vadd.f32 %v879_v27, %v734_v63  ;;  %1091 = vmatprep.mubr.bf16.mxu1 %v913_v25  ;;  %v903_v35 = vmax.f32 %v878_v28, 0.0 }
 0x2cd   : > { %v881_v31 = vpop.f32.mrf.mxu0  ;;  %1092 = vmatmul.mubr.bf16.gmra.mxu1 %v912_v26 }
 0x2ce   : > { %v882_v32 = vadd.f32 %v881_v31, %v738_v0  ;;  %v904_v33 = vmax.f32 %v880_v29, 0.0 }
 0x2cf   : > { %v885_v34 = vpop.f32.mrf.mxu0 }
 0x2d0   : > { %v905_v36 = vmax.f32 %v882_v32, 0.0  ;;  %v914_v40 = vpack.c.bf16 %v904_v33, %v902_v37  ;;  %v886_v44 = vadd.f32 %v885_v34, %v734_v63 }
 0x2d1   : > { %v887_v38 = vpop.f32.mrf.mxu0 }
 0x2d2   : > { %v915_v39 = vpack.c.bf16 %v905_v36, %v903_v35  ;;  %v888_v42 = vadd.f32 %v887_v38, %v738_v0  ;;  %v906_v50 = vmax.f32 %v886_v44, 0.0 }
 0x2d3   : > { %v889_v41 = vpop.f32.mrf.mxu0 }
 0x2d4   : > { %v890_v43 = vadd.f32 %v889_v41, %v734_v63  ;;  %1099 = vmatprep.mubr.bf16.mxu1 %v915_v39  ;;  %v907_v48 = vmax.f32 %v888_v42, 0.0 }
 0x2d5   : > { %v891_v45 = vpop.f32.mrf.mxu0  ;;  %1100 = vmatmul.mubr.bf16.gmra.mxu1 %v914_v40 }
 0x2d6   : > { %v892_v46 = vadd.f32 %v891_v45, %v738_v0  ;;  %v908_v47 = vmax.f32 %v890_v43, 0.0 }
 0x2d8   : > { %v909_v49 = vmax.f32 %v892_v46, 0.0  ;;  %v916_v55 = vpack.c.bf16 %v908_v47, %v906_v50 }
 0x2da   : > { %v917_v51 = vpack.c.bf16 %v909_v49, %v907_v48 }
 0x2dc   : > { %1107 = vmatprep.mubr.bf16.mxu1 %v917_v51 }
 0x2dd   : > { %1108 = vmatmul.mubr.bf16.gmra.mxu1 %v916_v55 }
 0x385   : > { %v1443_v56 = vpop.f32.mrf.mxu1 }
 0x387   : > { %v1444_v59 = vpop.f32.mrf.mxu1 }
 0x388   : > { %v1445_v60 = vadd.f32 %v1444_v59, %v1443_v56 }
 0x389   : > { %v1446_v58 = vpop.f32.mrf.mxu1 }
 0x38a   : > { %v1086_v63 = vadd.f32 %v1445_v60, %v1325_v57 }
 0x38b   : > { %v1447_v61 = vpop.f32.mrf.mxu1 }
 0x38c   : > { %v1448_v62 = vadd.f32 %v1447_v61, %v1446_v58 }
 0x38d   : > { %v1449_v0 = vpop.f32.mrf.mxu1 }
 0x38e   : > { %v1089_v1 = vadd.f32 %v1448_v62, %v1325_v57 }
 0x38f   : > { %v1450_v2 = vpop.f32.mrf.mxu1 }
 0x390   : > { %v1367_v3 = vpack.c.bf16 %v1089_v1, %v1086_v63  ;;  %v1451_v5 = vadd.f32 %v1450_v2, %v1449_v0 }
 0x391   : > { %v1452_v4 = vpop.f32.mrf.mxu1 }
 0x392   : > { %1368 = vst [vmem:[%s2034_s26] sm:$0xff] %v1367_v3   ;;  %v1094_v9 = vadd.f32 %v1451_v5, %v1325_v57 }
 0x393   : > { %v1453_v6 = vpop.f32.mrf.mxu1 }
 0x394   : > { %v1454_v7 = vadd.f32 %v1453_v6, %v1452_v4 }
 0x395   : > { %v1455_v8 = vpop.f32.mrf.mxu1 }
 0x396   : > { %v1097_v10 = vadd.f32 %v1454_v7, %v1325_v57 }
 0x397   : > { %v1456_v11 = vpop.f32.mrf.mxu1 }
 0x398   : > { %v1372_v12 = vpack.c.bf16 %v1097_v10, %v1094_v9  ;;  %v1457_v14 = vadd.f32 %v1456_v11, %v1455_v8 }
 0x399   : > { %v1458_v13 = vpop.f32.mrf.mxu1 }
 0x39a   : > { %1384 = vst [vmem:[%s2034_s26 + $0x8] sm:$0xff] %v1372_v12   ;;  %v1102_v17 = vadd.f32 %v1457_v14, %v1325_v57 }
 0x39b   : > { %v1459_v15 = vpop.f32.mrf.mxu1 }
 0x39c   : > { %v1460_v16 = vadd.f32 %v1459_v15, %v1458_v13 }
 0x39d   : > { %v1461_v53 = vpop.f32.mrf.mxu1 }
 0x39e   : > { %v1105_v52 = vadd.f32 %v1460_v16, %v1325_v57 }
 0x39f   : > { %v1462_v54 = vpop.f32.mrf.mxu1 }
 0x3a0   : > { %v1377_v18 = vpack.c.bf16 %v1105_v52, %v1102_v17  ;;  %v1463_v20 = vadd.f32 %v1462_v54, %v1461_v53 }
 0x3a1   : > { %v1464_v19 = vpop.f32.mrf.mxu1 }
 0x3a2   : > { %1385 = vst [vmem:[%s2034_s26 + $0x10] sm:$0xff] %v1377_v18   ;;  %v1110_v23 = vadd.f32 %v1463_v20, %v1325_v57 }
 0x3a3   : > { %v1465_v21 = vpop.f32.mrf.mxu1 }
 0x3a4   : > { %v1466_v22 = vadd.f32 %v1465_v21, %v1464_v19 }
 0x3a6   : > { %v1113_v24 = vadd.f32 %v1466_v22, %v1325_v57 }
 0x3a8   : > { %v1382_v25 = vpack.c.bf16 %v1113_v24, %v1110_v23 }
 0x3aa   : > { %1386 = vst [vmem:[%s2034_s26 + $0x18] sm:$0xff] %v1382_v25  }
 0x3ab   : > { %1709 = shalt.err (!%p1706_p11)
}
 0x3ac   : > { %s1710_s17 = scalar_lea.hbm %s2046_s11, 512  ;;  %s1714_s18 = scalar_lea.hbm %s2097_s6, 1024 }
 0x3ad   : > { %p1711_p0 = scmp.ne.s32.totalorder %s2046_s11, %s1710_s17  ;;  %p1715_p3 = scmp.lt.s32.totalorder %s2046_s11, %s2097_s6 }
 0x3ae   : > { %p1716_p2 = scmp.lt.s32.totalorder %s1714_s18, %s1710_s17 }
 0x3af   : > { %p1712_p1 = pnand %p1711_p0, %p1850_p5 }
 0x3b0   : > { %p1717_p10 = por %p1716_p2, %p1715_p3 }
 0x3b1   : > { %p1713_p13 = pneg %p1712_p1 }
 0x3b3   : > { %p1718_p12 = pnand %p1717_p10, %p1713_p13 }
 0x3b5   : > { %1721 = shalt.err (!%p1718_p12)
}
 0x3b6   : > { %s1775_s29 = smov 64   ;;  %s1776_s20 = smov 4  }
 0x3b7   : > { %1479 = dma.vmem_to_hbm [thread:$0]  (%p1850_p5), %s2041_s28, 512, %s2046_s11, %s2051_s13, %s1775_s29, %s1775_s29, %s1776_s20  }
 0x3b8 PF: > { %p1501_p4 = scmp.ge.s32.totalorder %s1764_s24, 2  ;;  %s1185_s10 = sand.u32 1, %s1752_s21  }
 0x3b9   : > { %p2107_p7 = scmp.ne.s32.totalorder %s2100_s8, 0  ;;  %s1186_s12 = scalar_lea.sflag [#allocation4], %s1185_s10 }
 0x3bb   : > { %p1492_p6 = pnand %p1501_p4, %p2107_p7 }
 0x3bd   : > { %p1493_p9 = pneg %p1492_p6 }
 0x3bf   : > { %1747 = dma.done.wait (%p1493_p9), %s1186_s12, 512  }
 0x3c0   : > { %1749 = vsyncadd (%p1493_p9), %s1186_s12, 4294966784  ;;  %p18_p8 = scmp.ge.s32.totalorder %s1837_s27, 4   ;;  %s2108_s21 = smov %s1756_s22 }
 0x3c1   : > { %s2109_s22 = smov %s1760_s23  ;;  %s2110_s23 = smov %s1848_s30 }
 0x3c2   : > { %s2111_s24 = smov %s1837_s27  ;;  %20 = sbr.rel (!%p18_p8) target bundleno = 5 (0x5), region = 93 }
 0x3c7   :  { %1191 = vsyncpa [#allocation3], 1 }
 0x3c8   :  { %1193 = vsyncpa [#allocation3 + $0x1], 1 }
 0x3c9   :  { %1194 = vsyncpa [#allocation6], 1 }
 0x3ca   :  { %1195 = vsyncpa [#allocation4], 1 }
 0x3cb   :  { %1197 = vsyncpa [#allocation4 + $0x1], 1 }

</bundles_post_ra>
